<compile_context>
chip_gen: v7x
topology: tpu7x:2x2x1
jax: 0.10.0
libtpu: 0.0.40
codegen_flags: <defaults>
</compile_context>

<pallas_src>
import functools

import jax
import jax.numpy as jnp
from jax.experimental import pallas as pl
from jax.experimental.pallas import tpu as pltpu


def _round_up(n, m):
    return ((n + m - 1) // m) * m


def bottleneck_kernel(x_ref, w1_ref, b1_ref, w2_ref, b2_ref, g_ref, beta_ref,
                      o_ref, acc_ref, *, d_features, eps, h_chunk):
    x = x_ref[...]                                            # (TB, D)
    x1 = x.astype(w1_ref.dtype)                               # explicit MXU dtype

    # ---- encode -> ReLU -> decode, chunked over the (padded) hidden dim ----
    # Caps the live f32 hidden temp at (TB, h_chunk); the decode result
    # accumulates into a (TB, D) f32 VMEM scratch. Padded hidden lanes have
    # zero w1 columns / b1 entries / w2 rows, so they contribute exactly 0.
    h_total = w1_ref.shape[1]
    for idx, c0 in enumerate(range(0, h_total, h_chunk)):
        hc = min(h_chunk, h_total - c0)
        h = jnp.dot(x1, w1_ref[:, c0:c0 + hc],
                    preferred_element_type=jnp.float32)
        h = jnp.maximum(h + b1_ref[:, c0:c0 + hc].astype(jnp.float32), 0.0)
        contrib = jnp.dot(h.astype(w2_ref.dtype), w2_ref[c0:c0 + hc, :],
                          preferred_element_type=jnp.float32)
        if idx == 0:
            acc_ref[...] = contrib
        else:
            acc_ref[...] += contrib

    # ---- dropout (inference identity) + residual, all in f32 ----
    xf = x.astype(jnp.float32)
    y = acc_ref[...] + b2_ref[...].astype(jnp.float32) + xf

    # ---- LayerNorm over the true feature count (single sums pass) ----
    # Note: single-pass variance (E[y^2]-mean^2) is clamped at 0; fine in f32
    # for near-zero-mean activations.
    inv_d = jnp.float32(1.0 / d_features)
    s1 = jnp.sum(y, axis=-1, keepdims=True)
    s2 = jnp.sum(y * y, axis=-1, keepdims=True)
    mean = s1 * inv_d
    var = jnp.maximum(s2 * inv_d - mean * mean, 0.0)
    rstd = jax.lax.rsqrt(var + jnp.float32(eps))
    # (Folding gamma into a scale/shift pair doesn't help here: rstd is
    #  per-row and gamma per-column, so the folded scale is full-rank.)
    ln = (y - mean) * rstd * g_ref[...].astype(jnp.float32) \
        + beta_ref[...].astype(jnp.float32)

    # ---- second residual add ----
    o_ref[...] = (ln + xf).astype(o_ref.dtype)


def prepare_params(w1, b1, w2, b2, gamma, beta, *, mxu_dtype=None):
    """One-time parameter prep: pad the hidden dim to a lane multiple and
    reshape 1-D params to (1, n). Call once, NOT per forward call."""
    d, h = w1.shape
    h_pad = _round_up(h, 128)
    wdt = mxu_dtype if mxu_dtype is not None else w1.dtype
    w1p = jnp.pad(w1.astype(wdt), ((0, 0), (0, h_pad - h)))       # (D, Hp)
    b1p = jnp.pad(b1, (0, h_pad - h)).reshape(1, h_pad)           # (1, Hp)
    w2p = jnp.pad(w2.astype(wdt), ((0, h_pad - h), (0, 0)))       # (Hp, D)
    b2p = b2.reshape(1, d)
    gp = gamma.reshape(1, d)
    bp = beta.reshape(1, d)
    return (w1p, b1p, w2p, b2p, gp, bp)


def linear_bottleneck(x, params, *, eps=1e-5, block_batch=512,
                      hidden_block=2048):
    """x: [B, D]; params from prepare_params."""
    w1p, b1p, w2p, b2p, gp, bp = params
    B, D = x.shape
    H_pad = w1p.shape[1]

    # Batch tile: dtype sublane pack (8 f32 / 16 bf16 / 32 int8) and at least
    # two grid steps when possible so v7x can shard the parallel axis over
    # both TensorCores.
    pack = {4: 8, 2: 16, 1: 32}.get(jnp.dtype(x.dtype).itemsize, 8)
    tb = max(pack, min(block_batch, _round_up(pl.cdiv(B, 2), pack)))
    tb = min(tb, _round_up(B, pack))
    grid_b = pl.cdiv(B, tb)

    h_chunk = min(H_pad, _round_up(hidden_block, 128))

    kernel = functools.partial(bottleneck_kernel, d_features=D, eps=eps,
                               h_chunk=h_chunk)

    itemsize = jnp.dtype(x.dtype).itemsize
    w_itemsize = jnp.dtype(w1p.dtype).itemsize
    d_lanes = max(D, 128)

    # VMEM budget: double-buffered x/out tiles, single-buffered resident
    # weights/params, (tb, D) f32 accumulator, (tb, h_chunk) f32 hidden temp.
    vmem_est = (
        2 * 2 * tb * d_lanes * itemsize
        + 2 * d_lanes * H_pad * w_itemsize
        + (H_pad + 3 * d_lanes) * 4
        + tb * d_lanes * 4
        + 2 * tb * h_chunk * 4
    )
    try:
        vmem_cap = pltpu.get_tpu_info().vmem_capacity_bytes
    except Exception:
        vmem_cap = 64 * 1024 * 1024        # conservative (v7x per-TC size)
    vmem_cap = max(32 * 1024 * 1024,
                   min(vmem_cap * 7 // 8, vmem_cap - 12 * 1024 * 1024))
    vmem_limit = int(min(vmem_cap, max(2 * vmem_est, 32 * 1024 * 1024)))

    flops = 2 * 2 * B * D * H_pad                              # two matmuls
    bytes_accessed = (2 * B * D * itemsize                     # x in, out
                      + 2 * D * H_pad * w_itemsize             # weights
                      + (H_pad + 3 * D) * 4)                   # small params

    def build(pipeline_mode):
        if pipeline_mode is None:
            resident = lambda shape: pl.BlockSpec(
                shape, lambda i: (0,) * len(shape))
        else:
            resident = lambda shape: pl.BlockSpec(
                shape, lambda i: (0,) * len(shape),
                pipeline_mode=pipeline_mode)
        tiled = lambda shape: pl.BlockSpec(shape, lambda i: (i, 0))
        return pl.pallas_call(
            kernel,
            out_shape=jax.ShapeDtypeStruct((B, D), x.dtype),
            grid_spec=pltpu.PrefetchScalarGridSpec(
                num_scalar_prefetch=0,
                grid=(grid_b,),
                in_specs=[
                    tiled((tb, D)),            # x (batch-tiled, pipelined)
                    resident((D, H_pad)),      # w1 (VMEM-resident)
                    resident((1, H_pad)),      # b1
                    resident((H_pad, D)),      # w2
                    resident((1, D)),          # b2
                    resident((1, D)),          # gamma
                    resident((1, D)),          # beta
                ],
                out_specs=tiled((tb, D)),
                scratch_shapes=[pltpu.VMEM((tb, D), jnp.float32)],
            ),
            compiler_params=pltpu.CompilerParams(
                dimension_semantics=("parallel",),
                vmem_limit_bytes=vmem_limit,
            ),
            cost_estimate=pl.CostEstimate(
                flops=flops, transcendentals=B,
                bytes_accessed=bytes_accessed),
        )

    args = (x, w1p, b1p, w2p, b2p, gp, bp)
    try:
        # Single-buffer the constant-index weight blocks (halves their VMEM).
        return build(pl.Buffered(1))(*args)
    except Exception:
        # Fallback for JAX builds that reject single-buffered resident blocks.
        return build(None)(*args)


def reference(x, w1, b1, w2, b2, gamma, beta, eps=1e-5):
    xf = x.astype(jnp.float32)
    h = jnp.maximum(xf @ w1 + b1, 0.0)
    d = h @ w2 + b2
    y = d + xf
    mean = jnp.mean(y, axis=-1, keepdims=True)
    var = jnp.mean((y - mean) ** 2, axis=-1, keepdims=True)
    ln = (y - mean) / jnp.sqrt(var + eps) * gamma + beta
    return (ln + xf).astype(x.dtype)


if __name__ == "__main__":
    B, D, H = 16, 32, 64  # batch, d_features, d_hid (d_out defaults to d_features)

    key = jax.random.PRNGKey(0)
    kx, k1, k2 = jax.random.split(key, 3)

    x = jax.random.normal(kx, (B, D), dtype=jnp.float32)

    # Xavier-normal init (matches nn.init.xavier_normal_), zero biases.
    std1 = (2.0 / (D + H)) ** 0.5
    std2 = (2.0 / (H + D)) ** 0.5
    w1 = jax.random.normal(k1, (D, H), dtype=jnp.float32) * std1   # encode.weight^T
    b1 = jnp.zeros((H,), dtype=jnp.float32)
    w2 = jax.random.normal(k2, (H, D), dtype=jnp.float32) * std2   # decode.weight^T
    b2 = jnp.zeros((D,), dtype=jnp.float32)
    gamma = jnp.ones((D,), dtype=jnp.float32)                      # layer_norm.weight
    beta = jnp.zeros((D,), dtype=jnp.float32)                      # layer_norm.bias

    # One-time parameter prep (hidden-dim padding happens here, not per call).
    params = prepare_params(w1, b1, w2, b2, gamma, beta)

    out = linear_bottleneck(x, params)
    out = jax.block_until_ready(out)

    ref = reference(x, w1, b1, w2, b2, gamma, beta)
    assert out.shape == (B, D)
    assert jnp.allclose(out, ref, atol=1e-4, rtol=1e-4), "mismatch vs reference"

    print("KERNEL_OK")
</pallas_src>

<mosaic_0001>
module attributes {stable_mosaic.version = 11 : i64} {
  func.func @bottleneck_kernel(%arg0: i32, %arg1: memref<8x32xf32, #tpu.memory_space<vmem>>, %arg2: memref<32x128xf32, #tpu.memory_space<vmem>>, %arg3: memref<1x128xf32, #tpu.memory_space<vmem>>, %arg4: memref<128x32xf32, #tpu.memory_space<vmem>>, %arg5: memref<1x32xf32, #tpu.memory_space<vmem>>, %arg6: memref<1x32xf32, #tpu.memory_space<vmem>>, %arg7: memref<1x32xf32, #tpu.memory_space<vmem>>, %arg8: memref<8x32xf32, #tpu.memory_space<vmem>>, %arg9: memref<8x32xf32, #tpu.memory_space<vmem>>) attributes {dimension_semantics = [#tpu.dimension_semantics<parallel>], iteration_bounds = array<i64: 2>, scalar_prefetch = 0 : i64, scratch_operands = 1 : i64, tpu.core_type = #tpu.core_type<tc>, window_params = [{transform_indices = @transform_0, window_bounds = array<i64: 8, 32>}, {pipeline_mode = #tpu.pipeline_mode<synchronous>, transform_indices = @transform_1, window_bounds = array<i64: 32, 128>}, {pipeline_mode = #tpu.pipeline_mode<synchronous>, transform_indices = @transform_2, window_bounds = array<i64: 1, 128>}, {pipeline_mode = #tpu.pipeline_mode<synchronous>, transform_indices = @transform_3, window_bounds = array<i64: 128, 32>}, {pipeline_mode = #tpu.pipeline_mode<synchronous>, transform_indices = @transform_4, window_bounds = array<i64: 1, 32>}, {pipeline_mode = #tpu.pipeline_mode<synchronous>, transform_indices = @transform_5, window_bounds = array<i64: 1, 32>}, {pipeline_mode = #tpu.pipeline_mode<synchronous>, transform_indices = @transform_6, window_bounds = array<i64: 1, 32>}, {transform_indices = @transform_7, window_bounds = array<i64: 8, 32>}]} {
    %c0 = arith.constant 0 : index
    %c0_0 = arith.constant 0 : index
    %0 = vector.load %arg1[%c0, %c0_0] : memref<8x32xf32, #tpu.memory_space<vmem>>, vector<8x32xf32>
    %c0_1 = arith.constant 0 : index
    %c0_2 = arith.constant 0 : index
    %1 = vector.load %arg2[%c0_1, %c0_2] : memref<32x128xf32, #tpu.memory_space<vmem>>, vector<32x128xf32>
    %cst = arith.constant dense<0.000000e+00> : vector<8x128xf32>
    %2 = tpu.matmul %0, %1, %cst {dimension_numbers = #tpu.dot_dimension_numbers<[1], [0], [0], [1], [0, 0, 1, 1], [], []>} : vector<8x32xf32>, vector<32x128xf32>, vector<8x128xf32> -> vector<8x128xf32>
    %c0_3 = arith.constant 0 : index
    %c0_4 = arith.constant 0 : index
    %3 = vector.load %arg3[%c0_3, %c0_4] : memref<1x128xf32, #tpu.memory_space<vmem>>, vector<1x128xf32>
    %4 = vector.broadcast %3 : vector<1x128xf32> to vector<8x128xf32>
    %5 = arith.addf %2, %4 : vector<8x128xf32>
    %cst_5 = arith.constant 0.000000e+00 : f32
    %6 = vector.broadcast %cst_5 : f32 to vector<8x128xf32>
    %7 = arith.maximumf %5, %6 : vector<8x128xf32>
    %c0_6 = arith.constant 0 : index
    %c0_7 = arith.constant 0 : index
    %8 = vector.load %arg4[%c0_6, %c0_7] : memref<128x32xf32, #tpu.memory_space<vmem>>, vector<128x32xf32>
    %cst_8 = arith.constant dense<0.000000e+00> : vector<8x32xf32>
    %9 = tpu.matmul %7, %8, %cst_8 {dimension_numbers = #tpu.dot_dimension_numbers<[1], [0], [0], [1], [0, 0, 1, 1], [], []>} : vector<8x128xf32>, vector<128x32xf32>, vector<8x32xf32> -> vector<8x32xf32>
    %c0_9 = arith.constant 0 : index
    %c0_10 = arith.constant 0 : index
    %10 = vector.load %arg9[%c0_9, %c0_10] : memref<8x32xf32, #tpu.memory_space<vmem>>, vector<8x32xf32>
    tpu.vector_store %arg9[%c0_9, %c0_10], %9 {strides = array<i32>} : memref<8x32xf32, #tpu.memory_space<vmem>>, vector<8x32xf32>,
    %c0_11 = arith.constant 0 : index
    %c0_12 = arith.constant 0 : index
    %11 = vector.load %arg9[%c0_11, %c0_12] : memref<8x32xf32, #tpu.memory_space<vmem>>, vector<8x32xf32>
    %c0_13 = arith.constant 0 : index
    %c0_14 = arith.constant 0 : index
    %12 = vector.load %arg5[%c0_13, %c0_14] : memref<1x32xf32, #tpu.memory_space<vmem>>, vector<1x32xf32>
    %13 = vector.broadcast %12 : vector<1x32xf32> to vector<8x32xf32>
    %14 = arith.addf %11, %13 : vector<8x32xf32>
    %15 = arith.addf %14, %0 : vector<8x32xf32>
    %cst_15 = arith.constant dense<0.000000e+00> : vector<8xf32>
    %16 = vector.multi_reduction <add>, %15, %cst_15 [1] : vector<8x32xf32> to vector<8xf32>
    %17 = vector.shape_cast %16 : vector<8xf32> to vector<8x1xf32>
    %18 = arith.mulf %15, %15 : vector<8x32xf32>
    %cst_16 = arith.constant dense<0.000000e+00> : vector<8xf32>
    %19 = vector.multi_reduction <add>, %18, %cst_16 [1] : vector<8x32xf32> to vector<8xf32>
    %20 = vector.shape_cast %19 : vector<8xf32> to vector<8x1xf32>
    %cst_17 = arith.constant 3.125000e-02 : f32
    %21 = vector.broadcast %cst_17 : f32 to vector<8x1xf32>
    %22 = arith.mulf %17, %21 : vector<8x1xf32>
    %cst_18 = arith.constant 3.125000e-02 : f32
    %23 = vector.broadcast %cst_18 : f32 to vector<8x1xf32>
    %24 = arith.mulf %20, %23 : vector<8x1xf32>
    %25 = arith.mulf %22, %22 : vector<8x1xf32>
    %26 = arith.subf %24, %25 : vector<8x1xf32>
    %cst_19 = arith.constant 0.000000e+00 : f32
    %27 = vector.broadcast %cst_19 : f32 to vector<8x1xf32>
    %28 = arith.maximumf %26, %27 : vector<8x1xf32>
    %cst_20 = arith.constant 9.99999974E-6 : f32
    %29 = vector.broadcast %cst_20 : f32 to vector<8x1xf32>
    %30 = arith.addf %28, %29 : vector<8x1xf32>
    %31 = math.rsqrt %30 : vector<8x1xf32>
    %32 = vector.broadcast %22 : vector<8x1xf32> to vector<8x32xf32>
    %33 = arith.subf %15, %32 : vector<8x32xf32>
    %34 = vector.broadcast %31 : vector<8x1xf32> to vector<8x32xf32>
    %35 = arith.mulf %33, %34 : vector<8x32xf32>
    %c0_21 = arith.constant 0 : index
    %c0_22 = arith.constant 0 : index
    %36 = vector.load %arg6[%c0_21, %c0_22] : memref<1x32xf32, #tpu.memory_space<vmem>>, vector<1x32xf32>
    %37 = vector.broadcast %36 : vector<1x32xf32> to vector<8x32xf32>
    %38 = arith.mulf %35, %37 : vector<8x32xf32>
    %c0_23 = arith.constant 0 : index
    %c0_24 = arith.constant 0 : index
    %39 = vector.load %arg7[%c0_23, %c0_24] : memref<1x32xf32, #tpu.memory_space<vmem>>, vector<1x32xf32>
    %40 = vector.broadcast %39 : vector<1x32xf32> to vector<8x32xf32>
    %41 = arith.addf %38, %40 : vector<8x32xf32>
    %42 = arith.addf %41, %0 : vector<8x32xf32>
    %c0_25 = arith.constant 0 : index
    %c0_26 = arith.constant 0 : index
    %43 = vector.load %arg8[%c0_25, %c0_26] : memref<8x32xf32, #tpu.memory_space<vmem>>, vector<8x32xf32>
    tpu.vector_store %arg8[%c0_25, %c0_26], %42 {strides = array<i32>} : memref<8x32xf32, #tpu.memory_space<vmem>>, vector<8x32xf32>,
    return
  }
  func.func @transform_0(%arg0: i32) -> (i32, i32) {
    %c0_i32 = arith.constant 0 : i32
    %c0_i32_0 = arith.constant 0 : i32
    return %arg0, %c0_i32 : i32, i32
  }
  func.func @transform_1(%arg0: i32) -> (i32, i32) {
    %c0_i32 = arith.constant 0 : i32
    %c0_i32_0 = arith.constant 0 : i32
    %c0_i32_1 = arith.constant 0 : i32
    return %c0_i32, %c0_i32_0 : i32, i32
  }
  func.func @transform_2(%arg0: i32) -> (i32, i32) {
    %c0_i32 = arith.constant 0 : i32
    %c0_i32_0 = arith.constant 0 : i32
    %c0_i32_1 = arith.constant 0 : i32
    return %c0_i32, %c0_i32_0 : i32, i32
  }
  func.func @transform_3(%arg0: i32) -> (i32, i32) {
    %c0_i32 = arith.constant 0 : i32
    %c0_i32_0 = arith.constant 0 : i32
    %c0_i32_1 = arith.constant 0 : i32
    return %c0_i32, %c0_i32_0 : i32, i32
  }
  func.func @transform_4(%arg0: i32) -> (i32, i32) {
    %c0_i32 = arith.constant 0 : i32
    %c0_i32_0 = arith.constant 0 : i32
    %c0_i32_1 = arith.constant 0 : i32
    return %c0_i32, %c0_i32_0 : i32, i32
  }
  func.func @transform_5(%arg0: i32) -> (i32, i32) {
    %c0_i32 = arith.constant 0 : i32
    %c0_i32_0 = arith.constant 0 : i32
    %c0_i32_1 = arith.constant 0 : i32
    return %c0_i32, %c0_i32_0 : i32, i32
  }
  func.func @transform_6(%arg0: i32) -> (i32, i32) {
    %c0_i32 = arith.constant 0 : i32
    %c0_i32_0 = arith.constant 0 : i32
    %c0_i32_1 = arith.constant 0 : i32
    return %c0_i32, %c0_i32_0 : i32, i32
  }
  func.func @transform_7(%arg0: i32) -> (i32, i32) {
    %c0_i32 = arith.constant 0 : i32
    %c0_i32_0 = arith.constant 0 : i32
    return %arg0, %c0_i32 : i32, i32
  }
}

module attributes {stable_mosaic.version = 11 : i64} {
  func.func @bottleneck_kernel(%arg0: i32, %arg1: memref<8x32xf32, #tpu.memory_space<vmem>>, %arg2: memref<32x128xf32, #tpu.memory_space<vmem>>, %arg3: memref<1x128xf32, #tpu.memory_space<vmem>>, %arg4: memref<128x32xf32, #tpu.memory_space<vmem>>, %arg5: memref<1x32xf32, #tpu.memory_space<vmem>>, %arg6: memref<1x32xf32, #tpu.memory_space<vmem>>, %arg7: memref<1x32xf32, #tpu.memory_space<vmem>>, %arg8: memref<8x32xf32, #tpu.memory_space<vmem>>, %arg9: memref<8x32xf32, #tpu.memory_space<vmem>>) attributes {dimension_semantics = [#tpu.dimension_semantics<parallel>], iteration_bounds = array<i64: 2>, scalar_prefetch = 0 : i64, scratch_operands = 1 : i64, tpu.core_type = #tpu.core_type<tc>, window_params = [{transform_indices = @transform_0, window_bounds = array<i64: 8, 32>}, {pipeline_mode = #tpu.pipeline_mode<synchronous>, transform_indices = @transform_1, window_bounds = array<i64: 32, 128>}, {pipeline_mode = #tpu.pipeline_mode<synchronous>, transform_indices = @transform_2, window_bounds = array<i64: 1, 128>}, {pipeline_mode = #tpu.pipeline_mode<synchronous>, transform_indices = @transform_3, window_bounds = array<i64: 128, 32>}, {pipeline_mode = #tpu.pipeline_mode<synchronous>, transform_indices = @transform_4, window_bounds = array<i64: 1, 32>}, {pipeline_mode = #tpu.pipeline_mode<synchronous>, transform_indices = @transform_5, window_bounds = array<i64: 1, 32>}, {pipeline_mode = #tpu.pipeline_mode<synchronous>, transform_indices = @transform_6, window_bounds = array<i64: 1, 32>}, {transform_indices = @transform_7, window_bounds = array<i64: 8, 32>}]} {
    %c0 = arith.constant 0 : index
    %c0_0 = arith.constant 0 : index
    %0 = vector.load %arg1[%c0, %c0_0] : memref<8x32xf32, #tpu.memory_space<vmem>>, vector<8x32xf32>
    %c0_1 = arith.constant 0 : index
    %c0_2 = arith.constant 0 : index
    %1 = vector.load %arg2[%c0_1, %c0_2] : memref<32x128xf32, #tpu.memory_space<vmem>>, vector<32x128xf32>
    %cst = arith.constant dense<0.000000e+00> : vector<8x128xf32>
    %2 = tpu.matmul %0, %1, %cst {dimension_numbers = #tpu.dot_dimension_numbers<[1], [0], [0], [1], [0, 0, 1, 1], [], []>} : vector<8x32xf32>, vector<32x128xf32>, vector<8x128xf32> -> vector<8x128xf32>
    %c0_3 = arith.constant 0 : index
    %c0_4 = arith.constant 0 : index
    %3 = vector.load %arg3[%c0_3, %c0_4] : memref<1x128xf32, #tpu.memory_space<vmem>>, vector<1x128xf32>
    %4 = vector.broadcast %3 : vector<1x128xf32> to vector<8x128xf32>
    %5 = arith.addf %2, %4 : vector<8x128xf32>
    %cst_5 = arith.constant 0.000000e+00 : f32
    %6 = vector.broadcast %cst_5 : f32 to vector<8x128xf32>
    %7 = arith.maximumf %5, %6 : vector<8x128xf32>
    %c0_6 = arith.constant 0 : index
    %c0_7 = arith.constant 0 : index
    %8 = vector.load %arg4[%c0_6, %c0_7] : memref<128x32xf32, #tpu.memory_space<vmem>>, vector<128x32xf32>
    %cst_8 = arith.constant dense<0.000000e+00> : vector<8x32xf32>
    %9 = tpu.matmul %7, %8, %cst_8 {dimension_numbers = #tpu.dot_dimension_numbers<[1], [0], [0], [1], [0, 0, 1, 1], [], []>} : vector<8x128xf32>, vector<128x32xf32>, vector<8x32xf32> -> vector<8x32xf32>
    %c0_9 = arith.constant 0 : index
    %c0_10 = arith.constant 0 : index
    %10 = vector.load %arg9[%c0_9, %c0_10] : memref<8x32xf32, #tpu.memory_space<vmem>>, vector<8x32xf32>
    tpu.vector_store %arg9[%c0_9, %c0_10], %9 {strides = array<i32>} : memref<8x32xf32, #tpu.memory_space<vmem>>, vector<8x32xf32>,
    %c0_11 = arith.constant 0 : index
    %c0_12 = arith.constant 0 : index
    %11 = vector.load %arg9[%c0_11, %c0_12] : memref<8x32xf32, #tpu.memory_space<vmem>>, vector<8x32xf32>
    %c0_13 = arith.constant 0 : index
    %c0_14 = arith.constant 0 : index
    %12 = vector.load %arg5[%c0_13, %c0_14] : memref<1x32xf32, #tpu.memory_space<vmem>>, vector<1x32xf32>
    %13 = vector.broadcast %12 : vector<1x32xf32> to vector<8x32xf32>
    %14 = arith.addf %11, %13 : vector<8x32xf32>
    %15 = arith.addf %14, %0 : vector<8x32xf32>
    %cst_15 = arith.constant dense<0.000000e+00> : vector<8xf32>
    %16 = vector.multi_reduction <add>, %15, %cst_15 [1] : vector<8x32xf32> to vector<8xf32>
    %17 = vector.shape_cast %16 : vector<8xf32> to vector<8x1xf32>
    %18 = arith.mulf %15, %15 : vector<8x32xf32>
    %cst_16 = arith.constant dense<0.000000e+00> : vector<8xf32>
    %19 = vector.multi_reduction <add>, %18, %cst_16 [1] : vector<8x32xf32> to vector<8xf32>
    %20 = vector.shape_cast %19 : vector<8xf32> to vector<8x1xf32>
    %cst_17 = arith.constant 3.125000e-02 : f32
    %21 = vector.broadcast %cst_17 : f32 to vector<8x1xf32>
    %22 = arith.mulf %17, %21 : vector<8x1xf32>
    %cst_18 = arith.constant 3.125000e-02 : f32
    %23 = vector.broadcast %cst_18 : f32 to vector<8x1xf32>
    %24 = arith.mulf %20, %23 : vector<8x1xf32>
    %25 = arith.mulf %22, %22 : vector<8x1xf32>
    %26 = arith.subf %24, %25 : vector<8x1xf32>
    %cst_19 = arith.constant 0.000000e+00 : f32
    %27 = vector.broadcast %cst_19 : f32 to vector<8x1xf32>
    %28 = arith.maximumf %26, %27 : vector<8x1xf32>
    %cst_20 = arith.constant 9.99999974E-6 : f32
    %29 = vector.broadcast %cst_20 : f32 to vector<8x1xf32>
    %30 = arith.addf %28, %29 : vector<8x1xf32>
    %31 = math.rsqrt %30 : vector<8x1xf32>
    %32 = vector.broadcast %22 : vector<8x1xf32> to vector<8x32xf32>
    %33 = arith.subf %15, %32 : vector<8x32xf32>
    %34 = vector.broadcast %31 : vector<8x1xf32> to vector<8x32xf32>
    %35 = arith.mulf %33, %34 : vector<8x32xf32>
    %c0_21 = arith.constant 0 : index
    %c0_22 = arith.constant 0 : index
    %36 = vector.load %arg6[%c0_21, %c0_22] : memref<1x32xf32, #tpu.memory_space<vmem>>, vector<1x32xf32>
    %37 = vector.broadcast %36 : vector<1x32xf32> to vector<8x32xf32>
    %38 = arith.mulf %35, %37 : vector<8x32xf32>
    %c0_23 = arith.constant 0 : index
    %c0_24 = arith.constant 0 : index
    %39 = vector.load %arg7[%c0_23, %c0_24] : memref<1x32xf32, #tpu.memory_space<vmem>>, vector<1x32xf32>
    %40 = vector.broadcast %39 : vector<1x32xf32> to vector<8x32xf32>
    %41 = arith.addf %38, %40 : vector<8x32xf32>
    %42 = arith.addf %41, %0 : vector<8x32xf32>
    %c0_25 = arith.constant 0 : index
    %c0_26 = arith.constant 0 : index
    %43 = vector.load %arg8[%c0_25, %c0_26] : memref<8x32xf32, #tpu.memory_space<vmem>>, vector<8x32xf32>
    tpu.vector_store %arg8[%c0_25, %c0_26], %42 {strides = array<i32>} : memref<8x32xf32, #tpu.memory_space<vmem>>, vector<8x32xf32>,
    return
  }
  func.func @transform_0(%arg0: i32) -> (i32, i32) {
    %c0_i32 = arith.constant 0 : i32
    %c0_i32_0 = arith.constant 0 : i32
    return %arg0, %c0_i32 : i32, i32
  }
  func.func @transform_1(%arg0: i32) -> (i32, i32) {
    %c0_i32 = arith.constant 0 : i32
    %c0_i32_0 = arith.constant 0 : i32
    %c0_i32_1 = arith.constant 0 : i32
    return %c0_i32, %c0_i32_0 : i32, i32
  }
  func.func @transform_2(%arg0: i32) -> (i32, i32) {
    %c0_i32 = arith.constant 0 : i32
    %c0_i32_0 = arith.constant 0 : i32
    %c0_i32_1 = arith.constant 0 : i32
    return %c0_i32, %c0_i32_0 : i32, i32
  }
  func.func @transform_3(%arg0: i32) -> (i32, i32) {
    %c0_i32 = arith.constant 0 : i32
    %c0_i32_0 = arith.constant 0 : i32
    %c0_i32_1 = arith.constant 0 : i32
    return %c0_i32, %c0_i32_0 : i32, i32
  }
  func.func @transform_4(%arg0: i32) -> (i32, i32) {
    %c0_i32 = arith.constant 0 : i32
    %c0_i32_0 = arith.constant 0 : i32
    %c0_i32_1 = arith.constant 0 : i32
    return %c0_i32, %c0_i32_0 : i32, i32
  }
  func.func @transform_5(%arg0: i32) -> (i32, i32) {
    %c0_i32 = arith.constant 0 : i32
    %c0_i32_0 = arith.constant 0 : i32
    %c0_i32_1 = arith.constant 0 : i32
    return %c0_i32, %c0_i32_0 : i32, i32
  }
  func.func @transform_6(%arg0: i32) -> (i32, i32) {
    %c0_i32 = arith.constant 0 : i32
    %c0_i32_0 = arith.constant 0 : i32
    %c0_i32_1 = arith.constant 0 : i32
    return %c0_i32, %c0_i32_0 : i32, i32
  }
  func.func @transform_7(%arg0: i32) -> (i32, i32) {
    %c0_i32 = arith.constant 0 : i32
    %c0_i32_0 = arith.constant 0 : i32
    return %arg0, %c0_i32 : i32, i32
  }
}

</mosaic_0001>

<bundles_post_ra>
// kernel: tpu_custom_call.1
= control target key start
LH: loop header
LB: loop body
LE: loop exit
PB: predicated region body
PF: predicated region fallthrough
CT: control target
= control target key end

     0   :  { %12 = vsyncpa [#allocation4], 0  ;;  %s1012_s0 = inlined_call_operand.vmem [shape: f32[16,32], index: 0, kind: input, shape index: {}]   ;;  %s1013_s1 = inlined_call_operand.vmem [shape: f32[32,128], index: 1, kind: input, shape index: {}]   ;;  %s1014_s2 = inlined_call_operand.vmem [shape: f32[1,128], index: 2, kind: input, shape index: {}]   ;;  %s1015_s3 = inlined_call_operand.vmem [shape: f32[128,32], index: 3, kind: input, shape index: {}]   ;;  %s1016_s4 = inlined_call_operand.vmem [shape: f32[1,32], index: 4, kind: input, shape index: {}]   ;;  %s1017_s5 = inlined_call_operand.vmem [shape: f32[1,32], index: 5, kind: input, shape index: {}]   ;;  %s1018_s6 = inlined_call_operand.vmem [shape: f32[1,32], index: 6, kind: input, shape index: {}]   ;;  %s1019_s7 = inlined_call_operand.hbm [shape: f32[16,32], index: 7, kind: output, shape index: {}]  }
   0x1   :  { %14 = vsyncpa [#allocation4 + $0x1], 0  ;;  %s830_s24 = smov 0   ;;  %s832_s25 = smov 0  }
   0x2   :  { %s834_s26 = smov 0   ;;  %s836_s27 = smov 0  }
   0x3 LB: > { %s851_s28 = sadd.s32 4294967295, %s784_s27   ;;  %s565_s29 = sadd.s32 4294967294, %s784_s27   ;;  %s784_s27 = sphi %s836_s27, %s1025_s27   ;;  %s780_s26 = sphi %s834_s26, %s1024_s26   ;;  %s776_s25 = sphi %s832_s25, %s1023_s25   ;;  %s772_s24 = sphi %s830_s24, %s1022_s24  }
   0x4   : > { %s855_s30 = sadd.s32 1, %s784_s27   ;;  %s179_s8 = sadd.s32 1, %s780_s26 }
   0x5   : > { %s176_s9 = ssub.s32 %s784_s27, %s855_s30  ;;  %p189_p0 = scmp.ne.s32.totalorder %s780_s26, %s776_s25 }
   0x6   : > { %p177_p1 = scmp.eq.s32.totalorder %s176_s9, 0  ;;  %p190_p2 = scmp.eq.s32.totalorder %s851_s28, 1 }
   0x7   : > { %p195_p3 = scmp.ne.s32.totalorder %s776_s25, %s772_s24  ;;  %p196_p4 = scmp.eq.s32.totalorder %s565_s29, 1 }
   0x8   : > { %s866_s10 = scalar_select %p177_p1, %s780_s26, %s179_s8  }
   0x9   : > { %p868_p5 = por %p190_p2, %p189_p0  ;;  %p872_p6 = por %p196_p4, %p195_p3 }
   0xa   : > { %p568_p7 = scmp.ge.s32.totalorder %s784_s27, 1  ;;  %p239_p8 = scmp.lt.s32.totalorder %s784_s27, 3 }
   0xc   : > { %p240_p9 = pnand %p568_p7, %p239_p8 }
   0xd   : > { %v275_v0 = vld [vmem:[%s1013_s1] sm:$0xff] (!%p240_p9)  ;;  %v276_v1 = vld [vmem:[%s1013_s1 + $0x8] sm:$0xff] (!%p240_p9)  ;;  %v277_v2 = vld [vmem:[%s1013_s1 + $0x10] sm:$0xff] (!%p240_p9)  ;;  %v786_v3 = vmov (!%p240_p9), 0.0|0.0   ;;  %vm787_vm0 = vmmov (!%p240_p9), 0   ;;  %v788_v6 = vmov (!%p240_p9), 0.0  }
   0xe   : > { %243 = sbr.rel (%p240_p9) target bundleno = 654 (0x28e), region = 48  ;;  %648 = vmatprep.subr.bf16.mxu0 (!%p240_p9), %v786_v3  ;;  %v649_v4 = vpack.c.bf16 (!%p240_p9), %v276_v1, %v275_v0  ;;  %v278_v5 = vld [vmem:[%s1013_s1 + $0x18] sm:$0xff] (!%p240_p9)  ;;  %610 = vmatprep.mubr.msk.f32.mxu0 (!%p240_p9), %vm787_vm0, %v788_v6  ;;  %p270_p10 = scmp.lt.s32.totalorder (!%p240_p9), %s851_s28, 1  ;;  %v361_v7 = vld [vmem:[%s1015_s3] sm:$0xff] (!%p240_p9)  ;;  %v362_v8 = vld [vmem:[%s1015_s3 + $0x8] sm:$0xff] (!%p240_p9)  ;;  %vm286_vm1 = vcmask (!%p240_p9), 261120  }
   0xf   : > { %654 = vmatprep.subr.bf16.mxu1 (!%p240_p9), %v786_v3  ;;  %v655_v9 = vpack.c.bf16 (!%p240_p9), %v362_v8, %v361_v7  ;;  %v363_v10 = vld [vmem:[%s1015_s3 + $0x10] sm:$0xff] (!%p240_p9)  ;;  %v364_v11 = vld [vmem:[%s1015_s3 + $0x18] sm:$0xff] (!%p240_p9)  ;;  %645 = vmatprep.mubr.msk.f32.mxu1 (!%p240_p9), %vm787_vm0, %v788_v6  ;;  %v652_v12 = vpack.c.bf16 (!%p240_p9), %v278_v5, %v277_v2  ;;  %v365_v14 = vld [vmem:[%s1015_s3 + $0x20] sm:$0xff] (!%p240_p9)  ;;  %s267_s20 = sand.u32 (!%p240_p9), 1, %s776_s25   ;;  %s577_s9 = sshll.u32 (!%p240_p9), %s851_s28, 7 }
  0x10   : > { %650 = vmatpush3.bf16.msra.mxu0 (!%p240_p9), %v649_v4  ;;  %v658_v13 = vpack.c.bf16 (!%p240_p9), %v364_v11, %v363_v10  ;;  %v366_v15 = vld [vmem:[%s1015_s3 + $0x28] sm:$0xff] (!%p240_p9)  ;;  %v367_v18 = vld [vmem:[%s1015_s3 + $0x30] sm:$0xff] (!%p240_p9)  ;;  %v368_v19 = vld [vmem:[%s1015_s3 + $0x38] sm:$0xff] (!%p240_p9)  ;;  %s569_s21 = sshll.u32 (!%p240_p9), %s267_s20, 3  ;;  %s969_s17 = scalar_lea.hbm (!%p240_p9), %s1019_s7, %s577_s9 }
  0x11   : > { %651 = vmatprep.subr.bf16.mxu0 (!%p240_p9), %v786_v3  ;;  %656 = vmatpush3.bf16.msra.mxu1 (!%p240_p9), %v655_v9  ;;  %v661_v17 = vpack.c.bf16 (!%p240_p9), %v366_v15, %v365_v14  ;;  %v664_v20 = vpack.c.bf16 (!%p240_p9), %v368_v19, %v367_v18  ;;  %v369_v21 = vld [vmem:[%s1015_s3 + $0x40] sm:$0xff] (!%p240_p9)  ;;  %v370_v22 = vld [vmem:[%s1015_s3 + $0x48] sm:$0xff] (!%p240_p9)  ;;  %v371_v24 = vld [vmem:[%s1015_s3 + $0x50] sm:$0xff] (!%p240_p9)  ;;  %s269_s13 = scalar_lea.vmem (!%p240_p9), [#allocation3], %s569_s21  ;;  %s493_s18 = scalar_lea.sflag (!%p240_p9), [#allocation4], %s267_s20 }
  0x12   : > { %657 = vmatprep.subr.bf16.mxu1 (!%p240_p9), %v786_v3  ;;  %v667_v23 = vpack.c.bf16 (!%p240_p9), %v370_v22, %v369_v21  ;;  %v372_v25 = vld [vmem:[%s1015_s3 + $0x58] sm:$0xff] (!%p240_p9)  ;;  %v373_v27 = vld [vmem:[%s1015_s3 + $0x60] sm:$0xff] (!%p240_p9)  ;;  %v374_v28 = vld [vmem:[%s1015_s3 + $0x68] sm:$0xff] (!%p240_p9)  ;;  %s506_s14 = sshll.u32 (!%p240_p9), %s269_s13, 4  ;;  %s971_s14 = int_to_ptr.vmem [resolvable:$true] %s506_s14 }
  0x13   : > { %v670_v26 = vpack.c.bf16 (!%p240_p9), %v372_v25, %v371_v24  ;;  %v673_v29 = vpack.c.bf16 (!%p240_p9), %v374_v28, %v373_v27  ;;  %v375_v30 = vld [vmem:[%s1015_s3 + $0x70] sm:$0xff] (!%p240_p9)  ;;  %v376_v31 = vld [vmem:[%s1015_s3 + $0x78] sm:$0xff] (!%p240_p9)  ;;  %v571_v33 = vld [vmem:[%s1014_s2] ss:$0 sm:$0xff] (!%p240_p9)  ;;  %s722_s19 = scalar_lea.vmem (!%p240_p9), %s971_s14, 128 }
  0x14   : > { %653 = vmatpush3.bf16.msra.mxu0 (!%p240_p9), %v652_v12  ;;  %v676_v32 = vpack.c.bf16 (!%p240_p9), %v376_v31, %v375_v30  ;;  %v573_v40 = vld [vmem:[%s1016_s4] ss:$0 sm:$0xff] (!%p240_p9)  ;;  %p723_p11 = scmp.ne.s32.totalorder (!%p240_p9), %s971_s14, %s722_s19 }
  0x15   : > { %s271_s15 = scalar_select %p270_p10, %s851_s28, 1  ;;  %659 = vmatpush3.bf16.msra.mxu1 %v658_v13  ;;  %v574_v57 = vld [vmem:[%s1017_s5] ss:$0 sm:$0xff] }
  0x16   : > { %660 = vmatprep.subr.bf16.mxu1 %v786_v3  ;;  %v575_v59 = vld [vmem:[%s1018_s6] ss:$0 sm:$0xff]  ;;  %p724_p12 = pnand %p723_p11, %p868_p5  ;;  %s789_s28 = smov [#allocation3]  }
  0x17   : > { %s570_s16 = sshll.u32 %s271_s15, 3  ;;  %s726_s21 = sshll.u32 %s789_s28, 4  ;;  %s727_s21 = int_to_ptr.vmem [resolvable:$false] %s726_s21 }
  0x18   : > { %s273_s23 = scalar_lea.vmem %s1012_s0, %s570_s16  ;;  %p725_p13 = pneg %p724_p12 }
  0x19   : > { %v913_v16 = vld [vmem:[%s273_s23] sm:$0xff]  ;;  %662 = vmatpush3.bf16.msra.mxu1 %v661_v17  ;;  %s728_s22 = scalar_lea.vmem %s727_s21, 256  ;;  %p729_p0 = scmp.lt.s32.totalorder %s971_s14, %s727_s21 }
  0x1a   : > { %611 = vmatmul.mubr.msk.f32.vlgmr.msra.gmra.mrb[0].mxu0 %vm286_vm1, %v913_v16  ;;  %663 = vmatprep.subr.bf16.mxu1 %v786_v3  ;;  %p730_p1 = scmp.lt.s32.totalorder %s728_s22, %s722_s19 }
  0x1c   : > { %p731_p2 = por %p730_p1, %p729_p0 }
  0x1d   : > { %665 = vmatpush3.bf16.msra.mxu1 %v664_v20 }
  0x1e   : > { %666 = vmatprep.subr.bf16.mxu1 %v786_v3  ;;  %p732_p3 = pnand %p731_p2, %p725_p13 }
  0x21   : > { %668 = vmatpush3.bf16.msra.mxu1 %v667_v23 }
  0x22   : > { %669 = vmatprep.subr.bf16.mxu1 %v786_v3 }
  0x25   : > { %671 = vmatpush3.bf16.msra.mxu1 %v670_v26 }
  0x26   : > { %672 = vmatprep.subr.bf16.mxu1 %v786_v3 }
  0x29   : > { %674 = vmatpush3.bf16.msra.mxu1 %v673_v29 }
  0x2a   : > { %675 = vmatprep.subr.bf16.mxu1 %v786_v3 }
  0x2d   : > { %677 = vmatpush3.bf16.msra.mxu1 %v676_v32 }
  0xed   : > { %v356_v34 = vpop.f32.mrb[0].mxu0 }
  0xee   : > { %v357_v35 = vadd.f32 %v571_v33, %v356_v34  ;;  %v612_v36 = vpop.f32.mrb[1].mxu0 }
  0xf0   : > { %v360_v37 = vmax.f32 %v357_v35, 0.0 }
  0xf2   : > { %646 = vmatmul.mubr.f32.vlgmr.msra.gmra.mrb[0].mxu1 %v360_v37 }
 0x1c5   : > { %v443_v38 = vpop.f32.mrb[0].mxu1 }
 0x1c6   : > { %447 = vst.msk [vmem:[#allocation2] sm:$0xff] %vm286_vm1, %v443_v38  ;;  %v647_v39 = vpop.f32.mrb[1].mxu1 }
 0x1cd   : > { %v448_v41 = vld [vmem:[#allocation2] sm:$0xff] }
 0x1ce   : > { %v456_v42 = vadd.f32 %v573_v40, %v448_v41 }
 0x1d0   : > { %v457_v43 = vadd.f32 %v456_v42, %v913_v16 }
 0x1d2   : > { %v458_v44 = vsel %vm286_vm1, %v457_v43, 0.0  ;;  %v461_v45 = vmul.f32 %v457_v43, %v457_v43 }
 0x1d3   : > { %459 = vadd.xlane.f32.xlu0 %v458_v44 }
 0x1d4   : > { %v462_v46 = vsel %vm286_vm1, %v461_v45, 0.0 }
 0x1d7   : > { %463 = vadd.xlane.f32.xlu0 %v462_v46 }
 0x260   : > { %v460_v47 = vpop.xlane.xlu0 %459 }
 0x261   : > { %v465_v48 = vmul.f32 0.03125, %v460_v47 }
 0x263   : > { %v467_v50 = vmul.f32 %v465_v48, %v465_v48  ;;  %v472_v55 = vsub.f32 %v457_v43, %v465_v48 }
 0x264   : > { %v464_v49 = vpop.xlane.xlu0 %463 }
 0x265   : > { %v466_v51 = vmul.f32 0.03125, %v464_v49 }
 0x267   : > { %v468_v52 = vsub.f32 %v466_v51, %v467_v50 }
 0x269   : > { %v469_v53 = vmax.f32 %v468_v52, 0.0 }
 0x26b   : > { %v470_v54 = vadd.f32 1e-05, %v469_v53 }
 0x26d   : > { %720 = vrsqrt.f32 %v470_v54 }
 0x277   : > { %v721_v56 = vpop.eup %720 }
 0x278   : > { %v473_v58 = vmul.f32 %v721_v56, %v472_v55 }
 0x27a   : > { %v481_v60 = vmul.f32 %v574_v57, %v473_v58 }
 0x27c   : > { %v489_v61 = vadd.f32 %v575_v59, %v481_v60 }
 0x27e   : > { %v490_v62 = vadd.f32 %v489_v61, %v913_v16 }
 0x280   : > { %491 = vst.msk [vmem:[%s269_s13] sm:$0xff] %vm286_vm1, %v490_v62 }
 0x281   : > { %735 = shalt.err (!%p732_p3)
}
 0x282   : > { %s736_s20 = scalar_lea.hbm %s969_s17, 128  ;;  %s740_s8 = scalar_lea.hbm %s1019_s7, 256 }
 0x283   : > { %p737_p4 = scmp.ne.s32.totalorder %s969_s17, %s736_s20  ;;  %p741_p9 = scmp.lt.u32.totalorder %s969_s17, %s1019_s7 }
 0x284   : > { %p742_p10 = scmp.lt.u32.totalorder %s740_s8, %s736_s20  ;;  %p744_p12 = scmp.lt.u32.totalorder %s736_s20, %s969_s17 }
 0x285   : > { %p738_p7 = pnand %p737_p4, %p868_p5 }
 0x286   : > { %p743_p11 = por %p742_p10, %p741_p9 }
 0x287   : > { %p739_p8 = pneg %p738_p7 }
 0x288   : > { %p745_p13 = por %p744_p12, %p743_p11 }
 0x28a   : > { %p746_p0 = pnand %p745_p13, %p739_p8 }
 0x28c   : > { %749 = shalt.err (!%p746_p0)
}
 0x28d   : > { %678 = dma.vmem_to_hbm [thread:$0]  (%p868_p5), %s971_s14, 128, %s969_s17, %s493_s18  }
 0x28e PF: > { %p684_p1 = scmp.ge.s32.totalorder %s784_s27, 2  ;;  %s518_s15 = sand.u32 1, %s772_s24  }
 0x28f   : > { %s519_s16 = scalar_lea.sflag [#allocation4], %s518_s15 }
 0x290   : > { %p681_p2 = pnand %p684_p1, %p872_p6 }
 0x292   : > { %767 = dma.done.wait (!%p681_p2), %s519_s16, 128  }
 0x293   : > { %769 = vsyncadd (!%p681_p2), %s519_s16, 4294967168  ;;  %p17_p3 = scmp.ge.s32.totalorder %s855_s30, 4   ;;  %s1022_s24 = smov %s776_s25 }
 0x294   : > { %s1023_s25 = smov %s780_s26  ;;  %s1024_s26 = smov %s866_s10 }
 0x295   : > { %s1025_s27 = smov %s855_s30  ;;  %19 = sbr.rel (!%p17_p3) target bundleno = 3 (0x3), region = 83 }
 0x29c   :  { %524 = vsyncpa [#allocation4], 1 }
 0x29d   :  { %526 = vsyncpa [#allocation4 + $0x1], 1 }

// kernel: tpu_custom_call.1
= control target key start
LH: loop header
LB: loop body
LE: loop exit
PB: predicated region body
PF: predicated region fallthrough
CT: control target
= control target key end

     0   :  { %12 = vsyncpa [#allocation4], 0  ;;  %s1012_s0 = inlined_call_operand.vmem [shape: f32[16,32], index: 0, kind: input, shape index: {}]   ;;  %s1013_s1 = inlined_call_operand.vmem [shape: f32[32,128], index: 1, kind: input, shape index: {}]   ;;  %s1014_s2 = inlined_call_operand.vmem [shape: f32[1,128], index: 2, kind: input, shape index: {}]   ;;  %s1015_s3 = inlined_call_operand.vmem [shape: f32[128,32], index: 3, kind: input, shape index: {}]   ;;  %s1016_s4 = inlined_call_operand.vmem [shape: f32[1,32], index: 4, kind: input, shape index: {}]   ;;  %s1017_s5 = inlined_call_operand.vmem [shape: f32[1,32], index: 5, kind: input, shape index: {}]   ;;  %s1018_s6 = inlined_call_operand.vmem [shape: f32[1,32], index: 6, kind: input, shape index: {}]   ;;  %s1019_s7 = inlined_call_operand.hbm [shape: f32[16,32], index: 7, kind: output, shape index: {}]  }
   0x1   :  { %14 = vsyncpa [#allocation4 + $0x1], 0  ;;  %s830_s24 = smov 0   ;;  %s832_s25 = smov 0  }
   0x2   :  { %s834_s26 = smov 0   ;;  %s836_s27 = smov 0  }
   0x3 LB: > { %s851_s28 = sadd.s32 4294967295, %s784_s27   ;;  %s565_s29 = sadd.s32 4294967294, %s784_s27   ;;  %s784_s27 = sphi %s836_s27, %s1025_s27   ;;  %s780_s26 = sphi %s834_s26, %s1024_s26   ;;  %s776_s25 = sphi %s832_s25, %s1023_s25   ;;  %s772_s24 = sphi %s830_s24, %s1022_s24  }
   0x4   : > { %s855_s30 = sadd.s32 1, %s784_s27   ;;  %s179_s8 = sadd.s32 1, %s780_s26 }
   0x5   : > { %s176_s9 = ssub.s32 %s784_s27, %s855_s30  ;;  %p189_p0 = scmp.ne.s32.totalorder %s780_s26, %s776_s25 }
   0x6   : > { %p177_p1 = scmp.eq.s32.totalorder %s176_s9, 0  ;;  %p190_p2 = scmp.eq.s32.totalorder %s851_s28, 1 }
   0x7   : > { %p195_p3 = scmp.ne.s32.totalorder %s776_s25, %s772_s24  ;;  %p196_p4 = scmp.eq.s32.totalorder %s565_s29, 1 }
   0x8   : > { %s866_s10 = scalar_select %p177_p1, %s780_s26, %s179_s8  }
   0x9   : > { %p868_p5 = por %p190_p2, %p189_p0  ;;  %p872_p6 = por %p196_p4, %p195_p3 }
   0xa   : > { %p568_p7 = scmp.ge.s32.totalorder %s784_s27, 1  ;;  %p239_p8 = scmp.lt.s32.totalorder %s784_s27, 3 }
   0xc   : > { %p240_p9 = pnand %p568_p7, %p239_p8 }
   0xd   : > { %v275_v0 = vld [vmem:[%s1013_s1] sm:$0xff] (!%p240_p9)  ;;  %v276_v1 = vld [vmem:[%s1013_s1 + $0x8] sm:$0xff] (!%p240_p9)  ;;  %v277_v2 = vld [vmem:[%s1013_s1 + $0x10] sm:$0xff] (!%p240_p9)  ;;  %v786_v3 = vmov (!%p240_p9), 0.0|0.0   ;;  %vm787_vm0 = vmmov (!%p240_p9), 0   ;;  %v788_v6 = vmov (!%p240_p9), 0.0  }
   0xe   : > { %243 = sbr.rel (%p240_p9) target bundleno = 654 (0x28e), region = 48  ;;  %648 = vmatprep.subr.bf16.mxu0 (!%p240_p9), %v786_v3  ;;  %v649_v4 = vpack.c.bf16 (!%p240_p9), %v276_v1, %v275_v0  ;;  %v278_v5 = vld [vmem:[%s1013_s1 + $0x18] sm:$0xff] (!%p240_p9)  ;;  %610 = vmatprep.mubr.msk.f32.mxu0 (!%p240_p9), %vm787_vm0, %v788_v6  ;;  %p270_p10 = scmp.lt.s32.totalorder (!%p240_p9), %s851_s28, 1  ;;  %v361_v7 = vld [vmem:[%s1015_s3] sm:$0xff] (!%p240_p9)  ;;  %v362_v8 = vld [vmem:[%s1015_s3 + $0x8] sm:$0xff] (!%p240_p9)  ;;  %vm286_vm1 = vcmask (!%p240_p9), 261120  }
   0xf   : > { %654 = vmatprep.subr.bf16.mxu1 (!%p240_p9), %v786_v3  ;;  %v655_v9 = vpack.c.bf16 (!%p240_p9), %v362_v8, %v361_v7  ;;  %v363_v10 = vld [vmem:[%s1015_s3 + $0x10] sm:$0xff] (!%p240_p9)  ;;  %v364_v11 = vld [vmem:[%s1015_s3 + $0x18] sm:$0xff] (!%p240_p9)  ;;  %645 = vmatprep.mubr.msk.f32.mxu1 (!%p240_p9), %vm787_vm0, %v788_v6  ;;  %v652_v12 = vpack.c.bf16 (!%p240_p9), %v278_v5, %v277_v2  ;;  %v365_v14 = vld [vmem:[%s1015_s3 + $0x20] sm:$0xff] (!%p240_p9)  ;;  %s267_s20 = sand.u32 (!%p240_p9), 1, %s776_s25   ;;  %s577_s9 = sshll.u32 (!%p240_p9), %s851_s28, 7 }
  0x10   : > { %650 = vmatpush3.bf16.msra.mxu0 (!%p240_p9), %v649_v4  ;;  %v658_v13 = vpack.c.bf16 (!%p240_p9), %v364_v11, %v363_v10  ;;  %v366_v15 = vld [vmem:[%s1015_s3 + $0x28] sm:$0xff] (!%p240_p9)  ;;  %v367_v18 = vld [vmem:[%s1015_s3 + $0x30] sm:$0xff] (!%p240_p9)  ;;  %v368_v19 = vld [vmem:[%s1015_s3 + $0x38] sm:$0xff] (!%p240_p9)  ;;  %s569_s21 = sshll.u32 (!%p240_p9), %s267_s20, 3  ;;  %s969_s17 = scalar_lea.hbm (!%p240_p9), %s1019_s7, %s577_s9 }
  0x11   : > { %651 = vmatprep.subr.bf16.mxu0 (!%p240_p9), %v786_v3  ;;  %656 = vmatpush3.bf16.msra.mxu1 (!%p240_p9), %v655_v9  ;;  %v661_v17 = vpack.c.bf16 (!%p240_p9), %v366_v15, %v365_v14  ;;  %v664_v20 = vpack.c.bf16 (!%p240_p9), %v368_v19, %v367_v18  ;;  %v369_v21 = vld [vmem:[%s1015_s3 + $0x40] sm:$0xff] (!%p240_p9)  ;;  %v370_v22 = vld [vmem:[%s1015_s3 + $0x48] sm:$0xff] (!%p240_p9)  ;;  %v371_v24 = vld [vmem:[%s1015_s3 + $0x50] sm:$0xff] (!%p240_p9)  ;;  %s269_s13 = scalar_lea.vmem (!%p240_p9), [#allocation3], %s569_s21  ;;  %s493_s18 = scalar_lea.sflag (!%p240_p9), [#allocation4], %s267_s20 }
  0x12   : > { %657 = vmatprep.subr.bf16.mxu1 (!%p240_p9), %v786_v3  ;;  %v667_v23 = vpack.c.bf16 (!%p240_p9), %v370_v22, %v369_v21  ;;  %v372_v25 = vld [vmem:[%s1015_s3 + $0x58] sm:$0xff] (!%p240_p9)  ;;  %v373_v27 = vld [vmem:[%s1015_s3 + $0x60] sm:$0xff] (!%p240_p9)  ;;  %v374_v28 = vld [vmem:[%s1015_s3 + $0x68] sm:$0xff] (!%p240_p9)  ;;  %s506_s14 = sshll.u32 (!%p240_p9), %s269_s13, 4  ;;  %s971_s14 = int_to_ptr.vmem [resolvable:$true] %s506_s14 }
  0x13   : > { %v670_v26 = vpack.c.bf16 (!%p240_p9), %v372_v25, %v371_v24  ;;  %v673_v29 = vpack.c.bf16 (!%p240_p9), %v374_v28, %v373_v27  ;;  %v375_v30 = vld [vmem:[%s1015_s3 + $0x70] sm:$0xff] (!%p240_p9)  ;;  %v376_v31 = vld [vmem:[%s1015_s3 + $0x78] sm:$0xff] (!%p240_p9)  ;;  %v571_v33 = vld [vmem:[%s1014_s2] ss:$0 sm:$0xff] (!%p240_p9)  ;;  %s722_s19 = scalar_lea.vmem (!%p240_p9), %s971_s14, 128 }
  0x14   : > { %653 = vmatpush3.bf16.msra.mxu0 (!%p240_p9), %v652_v12  ;;  %v676_v32 = vpack.c.bf16 (!%p240_p9), %v376_v31, %v375_v30  ;;  %v573_v40 = vld [vmem:[%s1016_s4] ss:$0 sm:$0xff] (!%p240_p9)  ;;  %p723_p11 = scmp.ne.s32.totalorder (!%p240_p9), %s971_s14, %s722_s19 }
  0x15   : > { %s271_s15 = scalar_select %p270_p10, %s851_s28, 1  ;;  %659 = vmatpush3.bf16.msra.mxu1 %v658_v13  ;;  %v574_v57 = vld [vmem:[%s1017_s5] ss:$0 sm:$0xff] }
  0x16   : > { %660 = vmatprep.subr.bf16.mxu1 %v786_v3  ;;  %v575_v59 = vld [vmem:[%s1018_s6] ss:$0 sm:$0xff]  ;;  %p724_p12 = pnand %p723_p11, %p868_p5  ;;  %s789_s28 = smov [#allocation3]  }
  0x17   : > { %s570_s16 = sshll.u32 %s271_s15, 3  ;;  %s726_s21 = sshll.u32 %s789_s28, 4  ;;  %s727_s21 = int_to_ptr.vmem [resolvable:$false] %s726_s21 }
  0x18   : > { %s273_s23 = scalar_lea.vmem %s1012_s0, %s570_s16  ;;  %p725_p13 = pneg %p724_p12 }
  0x19   : > { %v913_v16 = vld [vmem:[%s273_s23] sm:$0xff]  ;;  %662 = vmatpush3.bf16.msra.mxu1 %v661_v17  ;;  %s728_s22 = scalar_lea.vmem %s727_s21, 256  ;;  %p729_p0 = scmp.lt.s32.totalorder %s971_s14, %s727_s21 }
  0x1a   : > { %611 = vmatmul.mubr.msk.f32.vlgmr.msra.gmra.mrb[0].mxu0 %vm286_vm1, %v913_v16  ;;  %663 = vmatprep.subr.bf16.mxu1 %v786_v3  ;;  %p730_p1 = scmp.lt.s32.totalorder %s728_s22, %s722_s19 }
  0x1c   : > { %p731_p2 = por %p730_p1, %p729_p0 }
  0x1d   : > { %665 = vmatpush3.bf16.msra.mxu1 %v664_v20 }
  0x1e   : > { %666 = vmatprep.subr.bf16.mxu1 %v786_v3  ;;  %p732_p3 = pnand %p731_p2, %p725_p13 }
  0x21   : > { %668 = vmatpush3.bf16.msra.mxu1 %v667_v23 }
  0x22   : > { %669 = vmatprep.subr.bf16.mxu1 %v786_v3 }
  0x25   : > { %671 = vmatpush3.bf16.msra.mxu1 %v670_v26 }
  0x26   : > { %672 = vmatprep.subr.bf16.mxu1 %v786_v3 }
  0x29   : > { %674 = vmatpush3.bf16.msra.mxu1 %v673_v29 }
  0x2a   : > { %675 = vmatprep.subr.bf16.mxu1 %v786_v3 }
  0x2d   : > { %677 = vmatpush3.bf16.msra.mxu1 %v676_v32 }
  0xed   : > { %v356_v34 = vpop.f32.mrb[0].mxu0 }
  0xee   : > { %v357_v35 = vadd.f32 %v571_v33, %v356_v34  ;;  %v612_v36 = vpop.f32.mrb[1].mxu0 }
  0xf0   : > { %v360_v37 = vmax.f32 %v357_v35, 0.0 }
  0xf2   : > { %646 = vmatmul.mubr.f32.vlgmr.msra.gmra.mrb[0].mxu1 %v360_v37 }
 0x1c5   : > { %v443_v38 = vpop.f32.mrb[0].mxu1 }
 0x1c6   : > { %447 = vst.msk [vmem:[#allocation2] sm:$0xff] %vm286_vm1, %v443_v38  ;;  %v647_v39 = vpop.f32.mrb[1].mxu1 }
 0x1cd   : > { %v448_v41 = vld [vmem:[#allocation2] sm:$0xff] }
 0x1ce   : > { %v456_v42 = vadd.f32 %v573_v40, %v448_v41 }
 0x1d0   : > { %v457_v43 = vadd.f32 %v456_v42, %v913_v16 }
 0x1d2   : > { %v458_v44 = vsel %vm286_vm1, %v457_v43, 0.0  ;;  %v461_v45 = vmul.f32 %v457_v43, %v457_v43 }
 0x1d3   : > { %459 = vadd.xlane.f32.xlu0 %v458_v44 }
 0x1d4   : > { %v462_v46 = vsel %vm286_vm1, %v461_v45, 0.0 }
 0x1d7   : > { %463 = vadd.xlane.f32.xlu0 %v462_v46 }
 0x260   : > { %v460_v47 = vpop.xlane.xlu0 %459 }
 0x261   : > { %v465_v48 = vmul.f32 0.03125, %v460_v47 }
 0x263   : > { %v467_v50 = vmul.f32 %v465_v48, %v465_v48  ;;  %v472_v55 = vsub.f32 %v457_v43, %v465_v48 }
 0x264   : > { %v464_v49 = vpop.xlane.xlu0 %463 }
 0x265   : > { %v466_v51 = vmul.f32 0.03125, %v464_v49 }
 0x267   : > { %v468_v52 = vsub.f32 %v466_v51, %v467_v50 }
 0x269   : > { %v469_v53 = vmax.f32 %v468_v52, 0.0 }
 0x26b   : > { %v470_v54 = vadd.f32 1e-05, %v469_v53 }
 0x26d   : > { %720 = vrsqrt.f32 %v470_v54 }
 0x277   : > { %v721_v56 = vpop.eup %720 }
 0x278   : > { %v473_v58 = vmul.f32 %v721_v56, %v472_v55 }
 0x27a   : > { %v481_v60 = vmul.f32 %v574_v57, %v473_v58 }
 0x27c   : > { %v489_v61 = vadd.f32 %v575_v59, %v481_v60 }
 0x27e   : > { %v490_v62 = vadd.f32 %v489_v61, %v913_v16 }
 0x280   : > { %491 = vst.msk [vmem:[%s269_s13] sm:$0xff] %vm286_vm1, %v490_v62 }
 0x281   : > { %735 = shalt.err (!%p732_p3)
}
 0x282   : > { %s736_s20 = scalar_lea.hbm %s969_s17, 128  ;;  %s740_s8 = scalar_lea.hbm %s1019_s7, 256 }
 0x283   : > { %p737_p4 = scmp.ne.s32.totalorder %s969_s17, %s736_s20  ;;  %p741_p9 = scmp.lt.u32.totalorder %s969_s17, %s1019_s7 }
 0x284   : > { %p742_p10 = scmp.lt.u32.totalorder %s740_s8, %s736_s20  ;;  %p744_p12 = scmp.lt.u32.totalorder %s736_s20, %s969_s17 }
 0x285   : > { %p738_p7 = pnand %p737_p4, %p868_p5 }
 0x286   : > { %p743_p11 = por %p742_p10, %p741_p9 }
 0x287   : > { %p739_p8 = pneg %p738_p7 }
 0x288   : > { %p745_p13 = por %p744_p12, %p743_p11 }
 0x28a   : > { %p746_p0 = pnand %p745_p13, %p739_p8 }
 0x28c   : > { %749 = shalt.err (!%p746_p0)
}
 0x28d   : > { %678 = dma.vmem_to_hbm [thread:$0]  (%p868_p5), %s971_s14, 128, %s969_s17, %s493_s18  }
 0x28e PF: > { %p684_p1 = scmp.ge.s32.totalorder %s784_s27, 2  ;;  %s518_s15 = sand.u32 1, %s772_s24  }
 0x28f   : > { %s519_s16 = scalar_lea.sflag [#allocation4], %s518_s15 }
 0x290   : > { %p681_p2 = pnand %p684_p1, %p872_p6 }
 0x292   : > { %767 = dma.done.wait (!%p681_p2), %s519_s16, 128  }
 0x293   : > { %769 = vsyncadd (!%p681_p2), %s519_s16, 4294967168  ;;  %p17_p3 = scmp.ge.s32.totalorder %s855_s30, 4   ;;  %s1022_s24 = smov %s776_s25 }
 0x294   : > { %s1023_s25 = smov %s780_s26  ;;  %s1024_s26 = smov %s866_s10 }
 0x295   : > { %s1025_s27 = smov %s855_s30  ;;  %19 = sbr.rel (!%p17_p3) target bundleno = 3 (0x3), region = 83 }
 0x29c   :  { %524 = vsyncpa [#allocation4], 1 }
 0x29d   :  { %526 = vsyncpa [#allocation4 + $0x1], 1 }

</bundles_post_ra>
